<compile_context>
chip_gen: v5e
topology: v5e:2x2
jax: 0.10.0
libtpu: 0.0.40
codegen_flags: <defaults>
</compile_context>

<pallas_src>
import math
from types import SimpleNamespace

import numpy as np
import jax
import jax.numpy as jnp
from jax import lax
from jax.experimental import pallas as pl
from jax.experimental.pallas import tpu as pltpu

BN_EPS = 1e-5
REF_PREC = lax.Precision.HIGHEST  # reference only (matches PyTorch f32 math)


# --------------------- roll-convention calibration (one tiny kernel) ---------------------
_ROLL_LIKE_JNP = None


def _roll_like_jnp():
    global _ROLL_LIKE_JNP
    if _ROLL_LIKE_JNP is None:
        x = jnp.arange(8 * 128, dtype=jnp.float32).reshape(8, 128)

        def k(x_ref, o_ref):
            o_ref[...] = pltpu.roll(x_ref[...], 1, axis=1)

        y = pl.pallas_call(k, out_shape=jax.ShapeDtypeStruct((8, 128), jnp.float32))(x)
        _ROLL_LIKE_JNP = bool(
            np.array_equal(np.asarray(y), np.roll(np.asarray(x), 1, axis=1)))
    return _ROLL_LIKE_JNP


# ------------------------------------ layout helpers ------------------------------------

def _round_up(x, m):
    return (x + m - 1) // m * m


def _stage_lens(L, n_blocks=4):
    lens = [L]
    for _ in range(n_blocks):
        lens.append(lens[-1] // 2)
    return lens


def _pad_slots(L):
    S = 16
    while S <= L:          # strictly greater so sample tails stay zero (roll wrap safety)
        S *= 2
    return S


def _make_layout(channels, n_filters, n_fc, n_out, B, S):
    """Row-band layout of the bf16 weight slab and the f32 bias/selector slab."""
    WA, BA = 16, 8                                   # bf16 / f32 sublane-tile alignment
    cin0 = _round_up(max(channels, 1), 8)            # pad input channels to 8
    convs, wr, br, width = [], 0, 0, cin0
    cin = cin0
    for cout in n_filters:
        for ci in (cin, cout):                       # conv1 then conv2 of the block
            st = _round_up(cout, WA)
            convs.append(SimpleNamespace(wrow=wr, wstride=st, brow=br, cin=ci, cout=cout))
            wr += 3 * st
            br += _round_up(cout, BA)
            width = max(width, ci)
        cin = cout
    dense = []
    for ci, co in ((n_filters[-1], n_fc), (n_fc, n_fc), (n_fc, n_out)):
        dense.append(SimpleNamespace(wrow=wr, wstride=0, brow=br, cin=ci, cout=co))
        wr += _round_up(co, WA)
        br += _round_up(co, BA)
        width = max(width, ci)
    sel_row = br
    br += B * S
    return SimpleNamespace(cin0=cin0, convs=convs, dense=dense, sel_row=sel_row,
                           w_rows=_round_up(wr, WA), w_width=width,
                           b_rows=_round_up(br, BA), b_width=max(B, 1))


# ------------------------------------ parameter packing ------------------------------------

def pack_params(conv_params, dense_params, layout, B, S, L, n_blocks=4):
    """Fold eval-mode BatchNorm into conv weight/bias; pack everything into one bf16
    weight slab + one tiny f32 bias/selector slab (built ONCE, reused every call)."""
    scale = 1.0 / math.sqrt(1.0 + BN_EPS)            # gamma=1, beta=0, mean=0, var=1
    wslab = np.zeros((layout.w_rows, layout.w_width), np.float32)
    bslab = np.zeros((layout.b_rows, layout.b_width), np.float32)

    flat = []
    for (W1, b1, W2, b2) in conv_params:
        flat += [(W1, b1), (W2, b2)]
    for (W, b), info in zip(flat, layout.convs):
        W = np.asarray(W, np.float32) * scale        # (cout, cin_real, 3)
        cout, cin_real, _ = W.shape
        for k in range(3):                           # tap k multiplies x[t + (k-1)*d]
            r = info.wrow + k * info.wstride
            wslab[r:r + cout, :cin_real] = W[:, :, k]
        bslab[info.brow:info.brow + cout, 0] = np.asarray(b, np.float32) * scale

    for (W, b), info in zip(dense_params, layout.dense):
        W = np.asarray(W, np.float32)
        wslab[info.wrow:info.wrow + info.cout, :info.cin] = W
        bslab[info.brow:info.brow + info.cout, 0] = np.asarray(b, np.float32)

    # mean-over-time selector: (B*S, B) with 1/n_last at the surviving dilated slots
    lens = _stage_lens(L, n_blocks)
    d_last, n_last = 1 << n_blocks, lens[-1]
    for b in range(B):
        for i in range(n_last):
            bslab[layout.sel_row + b * S + d_last * i, b] = 1.0 / n_last

    return jnp.asarray(wslab, jnp.bfloat16), jnp.asarray(bslab, jnp.float32)


# ----------------------------------- the Pallas kernel -----------------------------------

def _build_kernel(layout, B, S, lens, roll_like_jnp):
    N = B * S

    def shift_prev(x, d):   # result[:, i] = x[:, i - d]  (cyclic; wraps land on zero pad)
        return pltpu.roll(x, d if roll_like_jnp else N - d, axis=1)

    def shift_next(x, d):   # result[:, i] = x[:, i + d]
        return pltpu.roll(x, N - d if roll_like_jnp else d, axis=1)

    def kernel(x_ref, w_ref, b_ref, out_ref):
        # Per-stage validity masks from a lane iota: lane valid iff (lane%S) % d == 0
        # and (lane%S) < d*len.  Pure VPU work, no host arrays, no extra DMAs.
        lane = lax.broadcasted_iota(jnp.int32, (1, N), 1)
        loc = lane & (S - 1)

        def stage_mask(k):
            d = 1 << k
            ok = ((loc & (d - 1)) == 0) & (loc < d * lens[k])
            return jnp.where(ok, 1.0, 0.0).astype(jnp.float32)

        masks = [stage_mask(k) for k in range(len(lens))]

        def conv3(x_f32, info, d):
            # conv1d(k=3,'same') at dilation d, folded BN, as three accumulating MXU
            # matmuls on rolled bf16 operands (no tap concat is ever materialized).
            xb = x_f32.astype(jnp.bfloat16)
            co, ci, st, r = info.cout, info.cin, info.wstride, info.wrow
            acc = jnp.dot(w_ref[r + st:r + st + co, 0:ci], xb,
                          preferred_element_type=jnp.float32)            # center tap
            acc += jnp.dot(w_ref[r:r + co, 0:ci], shift_prev(xb, d),
                           preferred_element_type=jnp.float32)           # left tap
            acc += jnp.dot(w_ref[r + 2 * st:r + 2 * st + co, 0:ci], shift_next(xb, d),
                           preferred_element_type=jnp.float32)           # right tap
            return acc + b_ref[info.brow:info.brow + co, 0:1]

        x = x_ref[...]                                    # (cin0, N) f32, pad lanes zero
        for blk in range(4):
            d = 1 << blk
            c1, c2 = layout.convs[2 * blk], layout.convs[2 * blk + 1]
            x = jnp.maximum(conv3(x, c1, d), 0.0) * masks[blk]   # conv->BN->ReLU, re-zero pads
            x = jnp.maximum(conv3(x, c2, d), 0.0)                # conv->BN->ReLU
            x = jnp.maximum(x, shift_next(x, d))                 # max_pool1d(2), dilated in place
            x = x * masks[blk + 1]                               # keep only 2d-strided slots

        # mean over the remaining time steps, per sample: (C4, N) @ (N, B) -> (C4, B)
        sel = b_ref[layout.sel_row:layout.sel_row + N, 0:B]
        h = jnp.dot(x, sel, preferred_element_type=jnp.float32)

        def dense(info, h_in, relu):
            rows = _round_up(info.cout, 8)               # bands are zero-padded, slice result
            w = w_ref[info.wrow:info.wrow + rows, 0:info.cin]
            z = (jnp.dot(w, h_in.astype(jnp.bfloat16), preferred_element_type=jnp.float32)
                 + b_ref[info.brow:info.brow + rows, 0:1])
            z = z[0:info.cout, :]
            return jnp.maximum(z, 0.0) if relu else z

        h = dense(layout.dense[0], h, True)
        h = dense(layout.dense[1], h, True)
        z = dense(layout.dense[2], h, False)              # (n_out, B)
        out_ref[...] = pl.reciprocal(1.0 + jnp.exp(-z), approx=True)   # sigmoid

    return kernel


# ---------------------------------- host-side wrapper ----------------------------------

def make_cnn_forward(layout, B, C, L, S, lens, n_out):
    kernel = _build_kernel(layout, B, S, lens, _roll_like_jnp())
    vmem = pl.BlockSpec(memory_space=pltpu.MemorySpace.VMEM)
    call = pl.pallas_call(
        kernel,
        out_shape=jax.ShapeDtypeStruct((n_out, B), jnp.float32),
        in_specs=[vmem, vmem, vmem],
        out_specs=vmem,
    )

    @jax.jit
    def forward(x_ncl, wslab, bslab):
        # pad channels -> cin0 (8) and time -> S, fuse batch*time onto lanes
        x = jnp.pad(x_ncl.astype(jnp.float32),
                    ((0, 0), (0, layout.cin0 - C), (0, S - L)))
        x = jnp.transpose(x, (1, 0, 2)).reshape(layout.cin0, B * S)
        return jnp.transpose(call(x, wslab, bslab))       # (B, n_out)

    return forward


# ------------------------------------ parameter setup ------------------------------------

def _conv_init(key, cin, cout, k):
    kw, kb = jax.random.split(key)
    a = math.sqrt(6.0 / (cin * k + cout * k))             # xavier_uniform_
    W = jax.random.uniform(kw, (cout, cin, k), jnp.float32, -a, a)
    bb = 1.0 / math.sqrt(cin * k)                         # torch default bias init
    b = jax.random.uniform(kb, (cout,), jnp.float32, -bb, bb)
    return W, b


def _dense_init(key, fin, fout):
    kw, kb = jax.random.split(key)
    a = 1.0 / math.sqrt(fin)
    W = jax.random.uniform(kw, (fout, fin), jnp.float32, -a, a)
    b = jax.random.uniform(kb, (fout,), jnp.float32, -a, a)
    return W, b


def init_params(key, channels=2, n_filters=(24, 48, 96, 192), n_fc=64, n_out=1, k=3):
    keys = jax.random.split(key, 2 * len(n_filters) + 3)
    convs, ki, cin = [], 0, channels
    for cout in n_filters:
        W1, b1 = _conv_init(keys[ki], cin, cout, k); ki += 1
        W2, b2 = _conv_init(keys[ki], cout, cout, k); ki += 1
        convs.append((W1, b1, W2, b2))
        cin = cout
    d1 = _dense_init(keys[ki], n_filters[-1], n_fc); ki += 1
    d2 = _dense_init(keys[ki], n_fc, n_fc); ki += 1
    do = _dense_init(keys[ki], n_fc, n_out); ki += 1
    return convs, (d1, d2, do)


# ------------------------------------ pure-JAX reference ------------------------------------

def ref_forward(x_ncl, convs, denses):
    x = x_ncl.astype(jnp.float32)
    for (W1, b1, W2, b2) in convs:
        for W, b in ((W1, b1), (W2, b2)):
            x = lax.conv_general_dilated(x, W, (1,), 'SAME',
                                         dimension_numbers=('NCH', 'OIH', 'NCH'),
                                         precision=REF_PREC)
            x = x + b[None, :, None]
            x = x / jnp.sqrt(1.0 + BN_EPS)                # eval-mode BatchNorm1d
            x = jnp.maximum(x, 0.0)                       # dropout = identity
        B, C, L = x.shape
        h = L // 2
        x = x[:, :, :2 * h].reshape(B, C, h, 2).max(axis=-1)   # max_pool1d(2)
    feat = jnp.mean(x, axis=-1)
    (W1, b1), (W2, b2), (Wo, bo) = denses
    h = jnp.maximum(jnp.dot(feat, W1.T, precision=REF_PREC) + b1, 0.0)
    h = jnp.maximum(jnp.dot(h, W2.T, precision=REF_PREC) + b2, 0.0)
    return jax.nn.sigmoid(jnp.dot(h, Wo.T, precision=REF_PREC) + bo)


# ------------------------------------------- main -------------------------------------------

if __name__ == "__main__":
    key = jax.random.PRNGKey(0)
    kx, kp = jax.random.split(key)

    B, C, L = 2, 2, 60                                   # module defaults: channels=2, sample_size=60
    n_filters, n_fc, n_out = (24, 48, 96, 192), 64, 1
    S = _pad_slots(L)                                    # 64 padded time slots / sample
    lens = _stage_lens(L)                                # [60, 30, 15, 7, 3]

    x = jax.random.normal(kx, (B, C, L), jnp.float32)
    convs, denses = init_params(kp, channels=C, n_filters=n_filters, n_fc=n_fc, n_out=n_out)

    layout = _make_layout(C, n_filters, n_fc, n_out, B, S)
    wslab, bslab = pack_params(convs, denses, layout, B, S, L)   # packed ONCE
    forward = make_cnn_forward(layout, B, C, L, S, lens, n_out)

    out = jax.block_until_ready(forward(x, wslab, bslab))
    ref = jax.block_until_ready(ref_forward(x, convs, denses))

    assert out.shape == (B, n_out), out.shape
    # Tolerance reflects DEFAULT-precision (bf16 operands, f32 accumulate) MXU matmuls
    # vs. the full-f32 reference; structural bugs would miss by orders of magnitude more.
    np.testing.assert_allclose(np.asarray(out), np.asarray(ref), rtol=3e-2, atol=1e-2)

    print("KERNEL_OK")
</pallas_src>

<mosaic_0001>
module attributes {stable_mosaic.version = 11 : i64} {
  func.func @k(%arg0: memref<8x128xf32, #tpu.memory_space<vmem>>, %arg1: memref<8x128xf32, #tpu.memory_space<vmem>>) attributes {dimension_semantics = [], scalar_prefetch = 0 : i64, scratch_operands = 0 : i64, tpu.core_type = #tpu.core_type<tc>} {
    %c0 = arith.constant 0 : index
    %c0_0 = arith.constant 0 : index
    %0 = vector.load %arg0[%c0, %c0_0] : memref<8x128xf32, #tpu.memory_space<vmem>>, vector<8x128xf32>
    %c1_i32 = arith.constant 1 : i32
    %1 = tpu.dynamic_rotate %0 by %c1_i32 dim 1 : vector<8x128xf32>, i32 -> vector<8x128xf32>
    %c0_1 = arith.constant 0 : index
    %c0_2 = arith.constant 0 : index
    %2 = vector.load %arg1[%c0_1, %c0_2] : memref<8x128xf32, #tpu.memory_space<vmem>>, vector<8x128xf32>
    tpu.vector_store %arg1[%c0_1, %c0_2], %1 {strides = array<i32>} : memref<8x128xf32, #tpu.memory_space<vmem>>, vector<8x128xf32>,
    return
  }
}

</mosaic_0001>

<bundles_post_ra>
// kernel: tpu_custom_call.1
= control target key start
LH: loop header
LB: loop body
LE: loop exit
PB: predicated region body
PF: predicated region fallthrough
CT: control target
= control target key end

     0   :  { %6 = vsyncpa [#allocation3], 0  ;;  %s118_s0 = inlined_call_operand.hbm [shape: f32[8,128], index: 0, kind: input, shape index: {}]   ;;  %s119_s1 = inlined_call_operand.hbm [shape: f32[8,128], index: 1, kind: output, shape index: {}]  }
   0x1   :  { %7 = vsyncpa [#allocation4], 0  ;;  %s13_s8 = sshll.u32 %s118_s0, 4  ;;  %s99_s9 = smov [#allocation2]   ;;  %s14_s8 = int_to_ptr.hbm [resolvable:$true] %s13_s8 }
   0x2   :  { %s15_s10 = sshll.u32 %s99_s9, 4  ;;  %s16_s10 = int_to_ptr.vmem [resolvable:$true] %s15_s10 }
   0x3   :  { %18 = dma.hbm_to_vmem [thread:$0]  %s14_s8, 128, %s16_s10, [#allocation3]  }
   0x4   :  { %95 = dma.done.wait [#allocation3], 128  }
   0x5   :  { %96 = vsyncadd [#allocation3], 4294967168  ;;  %v23_v0 = vld [vmem:[#allocation2] sm:$0xff]  ;;  %s100_s11 = smov 1   ;;  %s101_s12 = smov [#allocation5]  }
   0x6   :  { %24 = vrot.lane.b32.xlu0 %v23_v0, %s100_s11  ;;  %s32_s13 = sshll.u32 %s101_s12, 4  ;;  %s34_s16 = sshll.u32 %s119_s1, 4  ;;  %s33_s13 = int_to_ptr.vmem [resolvable:$true] %s32_s13  ;;  %s35_s16 = int_to_ptr.hbm [resolvable:$true] %s34_s16 }
  0x78   :  { %v25_v1 = vpop.permute.xlu0 %24 }
  0x79   :  { %26 = vst [vmem:[#allocation5] sm:$0xff] %v25_v1 }
  0x7a   :  { %37 = dma.vmem_to_hbm [thread:$0]  %s33_s13, 128, %s35_s16, [#allocation4]  }
  0x7b   :  { %97 = dma.done.wait [#allocation4], 128  }
  0x7c   :  { %98 = vsyncadd [#allocation4], 4294967168 }
  0x7d   :  { %42 = vsyncpa [#allocation3], 1 }
  0x7e   :  { %43 = vsyncpa [#allocation4], 1 }

</bundles_post_ra>
